<compile_context>
chip_gen: v6e
topology: v6e:2x2x1
jax: 0.10.0
libtpu: 0.0.40
codegen_flags: <defaults>
</compile_context>

<pallas_src>
import functools
import math

import jax
import jax.numpy as jnp
from jax import lax
from jax.experimental import pallas as pl
from jax.experimental.pallas import tpu as pltpu


# --------------------------------------------------------------------------- #
# Kernel
# --------------------------------------------------------------------------- #
def _vector_dropout_kernel(seed_ref, x_ref, o_ref, *, keep_prob, inv_keep,
                           last_dim):
    """out = keep(vec) ? x * inv_keep : 0, keep decided per last-axis vector."""
    br, width = x_ref.shape                 # static block shape
    vec_per_row = width // last_dim         # width is a multiple of last_dim
    pid = pl.program_id(0)

    row = lax.broadcasted_iota(jnp.int32, (br, width), 0)
    col = lax.broadcasted_iota(jnp.int32, (br, width), 1)

    # col // last_dim computed exactly in f32 (col < width <= 4096 << 2**24;
    # the +0.5 guards against reciprocal-rounding at multiples of last_dim).
    col_div = jnp.floor(
        (col.astype(jnp.float32) + 0.5) * jnp.float32(1.0 / last_dim)
    ).astype(jnp.int32)

    # Global vector index: all `last_dim` components of a vector get the same
    # value, hence the same Bernoulli decision (matches mask over shape[:-1]).
    vec_idx = (pid * br + row) * vec_per_row + col_div

    # Counter-based hash (lowbias32) of (vector index XOR seed) -> U[0, 1).
    h = vec_idx.astype(jnp.uint32) ^ seed_ref[0].astype(jnp.uint32)
    h = (h ^ (h >> 16)) * jnp.uint32(0x7FEB352D)
    h = (h ^ (h >> 15)) * jnp.uint32(0x846CA68B)
    h = h ^ (h >> 16)
    u = pltpu.bitcast(h >> 8, jnp.int32).astype(jnp.float32) * jnp.float32(2.0 ** -24)

    keep = u < jnp.float32(keep_prob)
    # Native-dtype math (bf16 stays bf16); weak-typed scalars don't upcast.
    o_ref[...] = jnp.where(keep, x_ref[...] * inv_keep, 0).astype(o_ref.dtype)


# --------------------------------------------------------------------------- #
# Tiling helpers
# --------------------------------------------------------------------------- #
def _lane_dense_view(total, last_dim):
    """(rows, width, pad): width a multiple of 128 AND of last_dim."""
    base = (128 * last_dim) // math.gcd(128, last_dim)
    widths = [base * m for m in (8, 6, 4, 3, 2, 1) if base * m <= 4096] or [base]
    for w in widths:                        # biggest width that divides exactly
        if total % w == 0:
            return total // w, w, 0
    w = widths[0]                           # flat-pad the tail, slice off after
    rows = (total + w - 1) // w
    return rows, w, rows * w - total


def _vmem_budget():
    """(working-set budget, vmem_limit_bytes) sized from the chip's VMEM."""
    try:
        cap = int(pltpu.get_tpu_info().vmem_capacity_bytes)
    except Exception:
        cap = 64 << 20                      # conservative (v7x per-core VMEM)
    budget = max(8 << 20, min((cap * 2) // 5, 48 << 20))
    limit = min(budget + (16 << 20), (cap * 3) // 4)
    return budget, int(limit)


def _choose_block_rows(rows, width, itemsize, budget):
    """Largest row tile fitting the VMEM budget; split >=2 blocks if possible."""
    per_row = 4 * width * itemsize          # x-in + out, both double-buffered
    br = max(8, (budget // per_row) // 8 * 8)
    if br >= rows:
        if rows >= 16:                      # give both v7x TensorCores a block
            half = (rows + 1) // 2
            br = min(rows, ((half + 7) // 8) * 8)
        else:
            br = rows                       # full-dim block (any row count ok)
    return br


# --------------------------------------------------------------------------- #
# Wrapper
# --------------------------------------------------------------------------- #
@functools.partial(jax.jit, static_argnames=("drop_rate", "block_rows"))
def _vector_dropout_impl(x, seed, *, drop_rate, block_rows):
    keep_prob = 1.0 - drop_rate
    orig_shape = x.shape
    last_dim = int(orig_shape[-1]) if x.ndim else 1
    total = x.size

    rows, width, pad = _lane_dense_view(total, last_dim)
    xf = x.reshape(-1)
    if pad:
        xf = jnp.pad(xf, (0, pad))
    x2 = xf.reshape(rows, width)

    budget, vmem_limit = _vmem_budget()
    if block_rows is None:
        br = _choose_block_rows(rows, width, x.dtype.itemsize, budget)
    else:
        br = min(int(block_rows), rows)
        if br < rows:
            br = max(8, (br // 8) * 8)
    num_blocks = pl.cdiv(rows, br)

    kernel = functools.partial(
        _vector_dropout_kernel,
        keep_prob=float(keep_prob),
        inv_keep=float(1.0 / keep_prob),
        last_dim=last_dim,
    )

    out2 = pl.pallas_call(
        kernel,
        out_shape=jax.ShapeDtypeStruct((rows, width), x.dtype),
        grid=(num_blocks,),
        in_specs=[
            pl.BlockSpec(memory_space=pltpu.MemorySpace.SMEM),   # (1,) int32 seed
            pl.BlockSpec((br, width), lambda i: (i, 0)),         # x slab
        ],
        out_specs=pl.BlockSpec((br, width), lambda i: (i, 0)),
        compiler_params=pltpu.CompilerParams(
            dimension_semantics=("parallel",),
            vmem_limit_bytes=vmem_limit,
        ),
    )(seed, x2)

    outf = out2.reshape(-1)
    if pad:
        outf = outf[:total]
    return outf.reshape(orig_shape)


def _derive_seed(key_or_seed):
    """Collapse a jax PRNG key / raw key data / python int into int32[1]."""
    if isinstance(key_or_seed, int):
        return jnp.asarray([key_or_seed & 0x7FFFFFFF], dtype=jnp.int32)
    arr = jnp.asarray(key_or_seed)
    if jnp.issubdtype(arr.dtype, jax.dtypes.prng_key):
        bits = jax.random.bits(key_or_seed, (), jnp.uint32)
    else:
        bits = arr.reshape(-1)[-1].astype(jnp.uint32)
    return (bits & jnp.uint32(0x7FFFFFFF)).astype(jnp.int32).reshape((1,))


def vector_dropout(x, key, drop_rate, *, training=True, block_rows=None):
    """Pallas implementation of VectorDropout.forward.

    x:   [..., V, C] vector-channel tensor (C = 3 for GVP xyz components).
    key: jax PRNG key (or int seed) selecting the dropout mask.  Whole
         last-axis vectors are dropped together; survivors are scaled by
         1/(1-drop_rate).  Eval mode returns x unchanged.
    """
    drop_rate = float(drop_rate)
    if (not training) or drop_rate == 0.0:
        return x
    if not (0.0 < drop_rate < 1.0):
        raise ValueError(f"drop_rate must be in [0, 1), got {drop_rate}")
    seed = _derive_seed(key)
    return _vector_dropout_impl(x, seed, drop_rate=drop_rate,
                                block_rows=block_rows)


# --------------------------------------------------------------------------- #
# Demo / self-check
# --------------------------------------------------------------------------- #
if __name__ == "__main__":
    root = jax.random.PRNGKey(0)
    x_key, drop_key = jax.random.split(root)

    # GVP-like shape: 1024 nodes, 16 vector channels, 3 xyz components.
    N, V, D = 1024, 16, 3
    drop_rate = 0.25
    keep = 1.0 - drop_rate

    x = jax.random.normal(x_key, (N, V, D), dtype=jnp.float32)

    out = jax.block_until_ready(vector_dropout(x, drop_key, drop_rate,
                                               training=True))
    assert out.shape == x.shape and out.dtype == x.dtype

    # All components of a vector are dropped together; survivors are x / keep.
    kept = jnp.max(jnp.abs(out), axis=-1) > 0
    expected = jnp.where(kept[..., None], x * (1.0 / keep), 0.0).astype(x.dtype)
    assert bool(jnp.allclose(out, expected, rtol=1e-6, atol=1e-6)), \
        "kept vectors are not uniformly scaled / dropped vectors not zero"

    # Kept fraction close to keep_prob (16384 vectors -> sigma ~ 0.003).
    frac = float(jnp.mean(kept.astype(jnp.float32)))
    assert abs(frac - keep) < 0.05, f"kept fraction {frac} vs {keep}"

    # Deterministic for a fixed key.
    out2 = jax.block_until_ready(vector_dropout(x, drop_key, drop_rate,
                                                training=True))
    assert bool(jnp.array_equal(out, out2))

    # Ragged shape exercises the flat-pad + slice path (total % 384 != 0).
    x_odd = jax.random.normal(x_key, (7, 5, 3), dtype=jnp.float32)
    out_odd = jax.block_until_ready(vector_dropout(x_odd, drop_key, drop_rate))
    kept_odd = jnp.max(jnp.abs(out_odd), axis=-1) > 0
    exp_odd = jnp.where(kept_odd[..., None], x_odd * (1.0 / keep), 0.0)
    assert out_odd.shape == x_odd.shape
    assert bool(jnp.allclose(out_odd, exp_odd, rtol=1e-6, atol=1e-6))

    # Eval mode is identity.
    assert vector_dropout(x, drop_key, drop_rate, training=False) is x

    print("KERNEL_OK")
</pallas_src>

<mosaic_0001>
module attributes {stable_mosaic.version = 11 : i64} {
  func.func @_vector_dropout_kernel(%arg0: i32, %arg1: memref<1xi32, #tpu.memory_space<smem>>, %arg2: memref<8x3072xf32, #tpu.memory_space<vmem>>, %arg3: memref<8x3072xf32, #tpu.memory_space<vmem>>) attributes {dimension_semantics = [#tpu.dimension_semantics<parallel>], iteration_bounds = array<i64: 2>, scalar_prefetch = 0 : i64, scratch_operands = 0 : i64, tpu.core_type = #tpu.core_type<tc>, window_params = [{transform_indices = @transform_0, window_bounds = array<i64: 1>}, {transform_indices = @transform_1, window_bounds = array<i64: 8, 3072>}, {transform_indices = @transform_2, window_bounds = array<i64: 8, 3072>}]} {
    %0 = tpu.iota {dimensions = array<i32: 0>} : vector<8x3072xi32>
    %1 = tpu.iota {dimensions = array<i32: 1>} : vector<8x3072xi32>
    %2 = arith.sitofp %1 : vector<8x3072xi32> to vector<8x3072xf32>
    %cst = arith.constant 5.000000e-01 : f32
    %3 = vector.broadcast %cst : f32 to vector<8x3072xf32>
    %4 = arith.addf %2, %3 : vector<8x3072xf32>
    %cst_0 = arith.constant 0.333333343 : f32
    %5 = vector.broadcast %cst_0 : f32 to vector<8x3072xf32>
    %6 = arith.mulf %4, %5 : vector<8x3072xf32>
    %7 = math.floor %6 : vector<8x3072xf32>
    %8 = arith.fptosi %7 : vector<8x3072xf32> to vector<8x3072xi32>
    %c8_i32 = arith.constant 8 : i32
    %9 = arith.muli %arg0, %c8_i32 : i32
    %10 = vector.broadcast %9 : i32 to vector<8x3072xi32>
    %11 = arith.addi %10, %0 : vector<8x3072xi32>
    %c1024_i32 = arith.constant 1024 : i32
    %12 = vector.broadcast %c1024_i32 : i32 to vector<8x3072xi32>
    %13 = arith.muli %11, %12 : vector<8x3072xi32>
    %14 = arith.addi %13, %8 : vector<8x3072xi32>
    %c0 = arith.constant 0 : index
    %15 = memref.load %arg1[%c0] : memref<1xi32, #tpu.memory_space<smem>>
    %16 = vector.broadcast %15 : i32 to vector<8x3072xi32>
    %17 = arith.xori %14, %16 : vector<8x3072xi32>
    %c16_i32 = arith.constant 16 : i32
    %18 = vector.broadcast %c16_i32 : i32 to vector<8x3072xi32>
    %19 = arith.shrui %17, %18 : vector<8x3072xi32>
    %20 = arith.xori %17, %19 : vector<8x3072xi32>
    %c2146121005_i32 = arith.constant 2146121005 : i32
    %21 = vector.broadcast %c2146121005_i32 : i32 to vector<8x3072xi32>
    %22 = arith.muli %20, %21 : vector<8x3072xi32>
    %c15_i32 = arith.constant 15 : i32
    %23 = vector.broadcast %c15_i32 : i32 to vector<8x3072xi32>
    %24 = arith.shrui %22, %23 : vector<8x3072xi32>
    %25 = arith.xori %22, %24 : vector<8x3072xi32>
    %c-2073254261_i32 = arith.constant -2073254261 : i32
    %26 = vector.broadcast %c-2073254261_i32 : i32 to vector<8x3072xi32>
    %27 = arith.muli %25, %26 : vector<8x3072xi32>
    %c16_i32_1 = arith.constant 16 : i32
    %28 = vector.broadcast %c16_i32_1 : i32 to vector<8x3072xi32>
    %29 = arith.shrui %27, %28 : vector<8x3072xi32>
    %30 = arith.xori %27, %29 : vector<8x3072xi32>
    %c8_i32_2 = arith.constant 8 : i32
    %31 = vector.broadcast %c8_i32_2 : i32 to vector<8x3072xi32>
    %32 = arith.shrui %30, %31 : vector<8x3072xi32>
    %33 = tpu.bitcast %32 : vector<8x3072xi32> -> vector<8x3072xi32>
    %34 = arith.sitofp %33 : vector<8x3072xi32> to vector<8x3072xf32>
    %cst_3 = arith.constant 5.96046448E-8 : f32
    %35 = vector.broadcast %cst_3 : f32 to vector<8x3072xf32>
    %36 = arith.mulf %34, %35 : vector<8x3072xf32>
    %cst_4 = arith.constant 7.500000e-01 : f32
    %37 = vector.broadcast %cst_4 : f32 to vector<8x3072xf32>
    %38 = arith.cmpf olt, %36, %37 : vector<8x3072xf32>
    %c0_5 = arith.constant 0 : index
    %c0_6 = arith.constant 0 : index
    %39 = vector.load %arg2[%c0_5, %c0_6] : memref<8x3072xf32, #tpu.memory_space<vmem>>, vector<8x3072xf32>
    %cst_7 = arith.constant 1.33333337 : f32
    %40 = vector.broadcast %cst_7 : f32 to vector<8x3072xf32>
    %41 = arith.mulf %39, %40 : vector<8x3072xf32>
    %c0_i32 = arith.constant 0 : i32
    %42 = arith.sitofp %c0_i32 : i32 to f32
    %43 = vector.broadcast %42 : f32 to vector<8x3072xf32>
    %44 = arith.select %38, %41, %43 : vector<8x3072xi1>, vector<8x3072xf32>
    %c0_8 = arith.constant 0 : index
    %c0_9 = arith.constant 0 : index
    %45 = vector.load %arg3[%c0_8, %c0_9] : memref<8x3072xf32, #tpu.memory_space<vmem>>, vector<8x3072xf32>
    tpu.vector_store %arg3[%c0_8, %c0_9], %44 {strides = array<i32>} : memref<8x3072xf32, #tpu.memory_space<vmem>>, vector<8x3072xf32>,
    return
  }
  func.func @transform_0(%arg0: i32) -> i32 {
    %c0_i32 = arith.constant 0 : i32
    %c0_i32_0 = arith.constant 0 : i32
    return %c0_i32 : i32
  }
  func.func @transform_1(%arg0: i32) -> (i32, i32) {
    %c0_i32 = arith.constant 0 : i32
    %c0_i32_0 = arith.constant 0 : i32
    return %arg0, %c0_i32 : i32, i32
  }
  func.func @transform_2(%arg0: i32) -> (i32, i32) {
    %c0_i32 = arith.constant 0 : i32
    %c0_i32_0 = arith.constant 0 : i32
    return %arg0, %c0_i32 : i32, i32
  }
}

</mosaic_0001>

<bundles_post_ra>
// kernel: _vector_dropout_impl.1
= control target key start
LH: loop header
LB: loop body
LE: loop exit
PB: predicated region body
PF: predicated region fallthrough
CT: control target
= control target key end

     0   :  { %s878_s11 = smov 0   ;;  %s1086_s0 = inlined_call_operand.<no memory space> [shape: s32[1], index: 0, kind: input, shape index: {}]   ;;  %s1087_s1 = inlined_call_operand.vmem [shape: f32[16,3072], index: 1, kind: input, shape index: {}]   ;;  %s1088_s2 = inlined_call_operand.vmem [shape: f32[16,3072], index: 2, kind: output, shape index: {}]  }
   0x1   :  { %7 = sst [smem:[#allocation2]] %s1086_s0 }
   0x2 LB: > { %s785_s12 = sadd.s32 4294967295, %s858_s11   ;;  %p789_p0 = scmp.ge.s32.totalorder %s858_s11, 1  ;;  %s858_s11 = sphi %s878_s11, %s13_s11  }
   0x3   : > { %p113_p1 = scmp.lt.s32.totalorder %s858_s11, 3 }
   0x5   : > { %p114_p2 = pnand %p789_p0, %p113_p1 }
   0x6   : > { %p135_p3 = scmp.lt.s32.totalorder (!%p114_p2), %s785_s12, 1  ;;  %s792_s13 = sshll.u32 (!%p114_p2), %s785_s12, 3 }
   0x7   : > { %117 = sbr.rel (%p114_p2) target bundleno = 163 (0xa3), region = 28  ;;  %s890_s0 = sld [smem:[#allocation2]] (!%p114_p2) }
   0xc   : > { %v145_v0 = vlaneseq  ;;  %v293_v1 = vstv %s792_s13  ;;  %s1090_s12 = smov (!%p135_p3, %s785_s12), 1 }
   0xd   : > { %s795_s14 = smul.u32 192, %s1090_s12  ;;  %v920_v34 = vstv %s890_s0 }
   0xe   : > { %v146_v2 = vshrl.u32 %v145_v0, 7  ;;  %v888_v3 = vand.u32 127, %v145_v0 }
   0xf   : > { %s904_s17 = scalar_lea.vmem %s1087_s1, %s795_s14  ;;  %s955_s20 = scalar_lea.vmem %s1088_s2, %s795_s14 }
  0x10   : > { %v172_v4 = vcvt.s32.f32 %v888_v3  ;;  %v294_v5 = vadd.s32 %v293_v1, %v146_v2  ;;  %v149_v6 = vadd.s32 128, %v888_v3  ;;  %v150_v7 = vadd.s32 256, %v888_v3  ;;  %v634_v16 = vld [vmem:[%s904_s17] sm:$0xff]  ;;  %v635_v17 = vld [vmem:[%s904_s17 + $0x8] sm:$0xff]  ;;  %v636_v18 = vld [vmem:[%s904_s17 + $0x10] sm:$0xff] }
  0x11   : > { %v151_v8 = vadd.s32 384, %v888_v3  ;;  %v152_v9 = vadd.s32 512, %v888_v3  ;;  %v153_v10 = vadd.s32 640, %v888_v3  ;;  %v154_v14 = vadd.s32 768, %v888_v3  ;;  %v637_v29 = vld [vmem:[%s904_s17 + $0x18] sm:$0xff]  ;;  %v638_v37 = vld [vmem:[%s904_s17 + $0x20] sm:$0xff] }
  0x12   : > { %v196_v11 = vadd.f32 0.5, %v172_v4  ;;  %v173_v12 = vcvt.s32.f32 %v149_v6  ;;  %v174_v13 = vcvt.s32.f32 %v150_v7  ;;  %v907_v15 = vmul.u32 1024, %v294_v5  ;;  %v639_v43 = vld [vmem:[%s904_s17 + $0x28] sm:$0xff] }
  0x13   : > { %v175_v19 = vcvt.s32.f32 %v151_v8  ;;  %v176_v20 = vcvt.s32.f32 %v152_v9  ;;  %v177_v21 = vcvt.s32.f32 %v153_v10  ;;  %v912_v23 = vmul.f32 1.3333334, %v634_v16 }
  0x14   : > { %v220_v22 = vmul.f32 0.33333334, %v196_v11  ;;  %v197_v24 = vadd.f32 0.5, %v173_v12  ;;  %v198_v25 = vadd.f32 0.5, %v174_v13  ;;  %v914_v26 = vmul.f32 1.3333334, %v635_v17 }
  0x15   : > { %v916_v27 = vmul.f32 1.3333334, %v636_v18  ;;  %v199_v28 = vadd.f32 0.5, %v175_v19  ;;  %v178_v33 = vcvt.s32.f32 %v154_v14  ;;  %v200_v36 = vadd.f32 0.5, %v176_v20 }
  0x16   : > { %v244_v30 = vfloor.f32 %v220_v22  ;;  %v221_v31 = vmul.f32 0.33333334, %v197_v24  ;;  %v222_v32 = vmul.f32 0.33333334, %v198_v25  ;;  %v201_v38 = vadd.f32 0.5, %v177_v21 }
  0x17   : > { %v223_v35 = vmul.f32 0.33333334, %v199_v28  ;;  %v923_v42 = vmul.f32 1.3333334, %v637_v29  ;;  %v224_v45 = vmul.f32 0.33333334, %v200_v36 }
  0x18   : > { %v796_v39 = vtrunc.f32 %v244_v30  ;;  %v245_v40 = vfloor.f32 %v221_v31  ;;  %v246_v41 = vfloor.f32 %v222_v32  ;;  %v926_v46 = vmul.f32 1.3333334, %v638_v37 }
  0x19   : > { %v247_v44 = vfloor.f32 %v223_v35  ;;  %v225_v47 = vmul.f32 0.33333334, %v201_v38  ;;  %v202_v51 = vadd.f32 0.5, %v178_v33  ;;  %v248_v53 = vfloor.f32 %v224_v45 }
  0x1a   : > { %v797_v48 = vcvt.f32.s32 %v796_v39  ;;  %v798_v49 = vtrunc.f32 %v245_v40  ;;  %v800_v50 = vtrunc.f32 %v246_v41  ;;  %v928_v55 = vmul.f32 1.3333334, %v639_v43 }
  0x1b   : > { %v802_v52 = vtrunc.f32 %v247_v44  ;;  %v249_v54 = vfloor.f32 %v225_v47  ;;  %v226_v59 = vmul.f32 0.33333334, %v202_v51  ;;  %v804_v61 = vtrunc.f32 %v248_v53 }
  0x1c   : > { %v296_v56 = vadd.s32 %v797_v48, %v907_v15  ;;  %v799_v57 = vcvt.f32.s32 %v798_v49  ;;  %v801_v58 = vcvt.f32.s32 %v800_v50  ;;  %v155_v63 = vadd.s32 896, %v888_v3 }
  0x1d   : > { %v803_v60 = vcvt.f32.s32 %v802_v52  ;;  %v806_v62 = vtrunc.f32 %v249_v54  ;;  %v250_v4 = vfloor.f32 %v226_v59  ;;  %v805_v6 = vcvt.f32.s32 %v804_v61 }
  0x1e   : > { %v322_v0 = vxor.u32 %v920_v34, %v296_v56  ;;  %v297_v1 = vadd.s32 %v799_v57, %v907_v15  ;;  %v298_v2 = vadd.s32 %v801_v58, %v907_v15  ;;  %v179_v8 = vcvt.s32.f32 %v155_v63 }
  0x1f   : > { %v299_v5 = vadd.s32 %v803_v60, %v907_v15  ;;  %v807_v7 = vcvt.f32.s32 %v806_v62  ;;  %v808_v12 = vtrunc.f32 %v250_v4  ;;  %v300_v14 = vadd.s32 %v805_v6, %v907_v15 }
  0x20   : > { %v346_v9 = vshrl.u32 %v322_v0, 16  ;;  %v323_v10 = vxor.u32 %v920_v34, %v297_v1  ;;  %v324_v11 = vxor.u32 %v920_v34, %v298_v2  ;;  %v203_v17 = vadd.f32 0.5, %v179_v8 }
  0x21   : > { %v325_v13 = vxor.u32 %v920_v34, %v299_v5  ;;  %v301_v16 = vadd.s32 %v807_v7, %v907_v15  ;;  %v809_v21 = vcvt.f32.s32 %v808_v12  ;;  %v326_v24 = vxor.u32 %v920_v34, %v300_v14 }
  0x22   : > { %v370_v18 = vxor.u32 %v346_v9, %v322_v0  ;;  %v347_v19 = vshrl.u32 %v323_v10, 16  ;;  %v348_v20 = vshrl.u32 %v324_v11, 16  ;;  %v227_v28 = vmul.f32 0.33333334, %v203_v17 }
  0x23   : > { %v349_v22 = vshrl.u32 %v325_v13, 16  ;;  %v327_v25 = vxor.u32 %v920_v34, %v301_v16  ;;  %v302_v32 = vadd.s32 %v809_v21, %v907_v15  ;;  %v350_v35 = vshrl.u32 %v326_v24, 16 }
  0x24   : > { %v394_v29 = vmul.u32 2146121005, %v370_v18  ;;  %v371_v30 = vxor.u32 %v347_v19, %v323_v10  ;;  %v372_v31 = vxor.u32 %v348_v20, %v324_v11  ;;  %v251_v37 = vfloor.f32 %v227_v28 }
  0x25   : > { %v373_v33 = vxor.u32 %v349_v22, %v325_v13  ;;  %v351_v36 = vshrl.u32 %v327_v25, 16  ;;  %v328_v41 = vxor.u32 %v920_v34, %v302_v32  ;;  %v374_v44 = vxor.u32 %v350_v35, %v326_v24 }
  0x26   : > { %v418_v38 = vshrl.u32 %v394_v29, 15  ;;  %v395_v39 = vmul.u32 2146121005, %v371_v30  ;;  %v396_v40 = vmul.u32 2146121005, %v372_v31  ;;  %v810_v47 = vtrunc.f32 %v251_v37 }
  0x27   : > { %v397_v43 = vmul.u32 2146121005, %v373_v33  ;;  %v375_v45 = vxor.u32 %v351_v36, %v327_v25  ;;  %v352_v51 = vshrl.u32 %v328_v41, 16  ;;  %v398_v53 = vmul.u32 2146121005, %v374_v44 }
  0x28   : > { %v442_v48 = vxor.u32 %v418_v38, %v394_v29  ;;  %v419_v49 = vshrl.u32 %v395_v39, 15  ;;  %v420_v50 = vshrl.u32 %v396_v40, 15  ;;  %v811_v56 = vcvt.f32.s32 %v810_v47 }
  0x29   : > { %v421_v52 = vshrl.u32 %v397_v43, 15  ;;  %v399_v54 = vmul.u32 2146121005, %v375_v45  ;;  %v376_v60 = vxor.u32 %v352_v51, %v328_v41  ;;  %v422_v62 = vshrl.u32 %v398_v53, 15 }
  0x2a   : > { %v466_v57 = vmul.u32 2221713035, %v442_v48  ;;  %v443_v58 = vxor.u32 %v419_v49, %v395_v39  ;;  %v444_v59 = vxor.u32 %v420_v50, %v396_v40  ;;  %v303_v0 = vadd.s32 %v811_v56, %v907_v15 }
  0x2b   : > { %v445_v61 = vxor.u32 %v421_v52, %v397_v43  ;;  %v423_v63 = vshrl.u32 %v399_v54, 15  ;;  %v947_v5 = vadd.s32 1024, %v888_v3  ;;  %v446_v7 = vxor.u32 %v422_v62, %v398_v53 }
  0x2c   : > { %v490_v1 = vshrl.u32 %v466_v57, 16  ;;  %v467_v2 = vmul.u32 2221713035, %v443_v58  ;;  %v468_v4 = vmul.u32 2221713035, %v444_v59  ;;  %v329_v13 = vxor.u32 %v920_v34, %v303_v0  ;;  %v640_v58 = vld [vmem:[%s904_s17 + $0x30] sm:$0xff] }
  0x2d   : > { %v469_v6 = vmul.u32 2221713035, %v445_v61  ;;  %v447_v8 = vxor.u32 %v423_v63, %v399_v54  ;;  %v400_v9 = vmul.u32 2146121005, %v376_v60 }
  0x2e   : > { %v514_v10 = vxor.u32 %v490_v1, %v466_v57  ;;  %v491_v11 = vshrl.u32 %v467_v2, 16  ;;  %v492_v12 = vshrl.u32 %v468_v4, 16  ;;  %v470_v16 = vmul.u32 2221713035, %v446_v7 }
  0x2f   : > { %v493_v14 = vshrl.u32 %v469_v6, 16  ;;  %v471_v17 = vmul.u32 2221713035, %v447_v8  ;;  %v424_v18 = vshrl.u32 %v400_v9, 15  ;;  %v353_v22 = vshrl.u32 %v329_v13, 16 }
  0x30   : > { %v538_v19 = vshrl.u32 %v514_v10, 8  ;;  %v515_v20 = vxor.u32 %v491_v11, %v467_v2  ;;  %v516_v21 = vxor.u32 %v492_v12, %v468_v4  ;;  %v494_v25 = vshrl.u32 %v470_v16, 16  ;;  %v641_v2 = vld [vmem:[%s904_s17 + $0x38] sm:$0xff] }
  0x31   : > { %v517_v24 = vxor.u32 %v493_v14, %v469_v6  ;;  %v495_v28 = vshrl.u32 %v471_v17, 16  ;;  %v448_v29 = vxor.u32 %v424_v18, %v400_v9  ;;  %v377_v33 = vxor.u32 %v353_v22, %v329_v13  ;;  %v642_v6 = vld [vmem:[%s904_s17 + $0x40] sm:$0xff]  ;;  %v643_v9 = vld [vmem:[%s904_s17 + $0x48] sm:$0xff] }
  0x32   : > { %v562_v30 = vcvt.s32.f32 %v538_v19  ;;  %v539_v31 = vshrl.u32 %v515_v20, 8  ;;  %v540_v32 = vshrl.u32 %v516_v21, 8  ;;  %v518_v36 = vxor.u32 %v494_v25, %v470_v16  ;;  %v644_v19 = vld [vmem:[%s904_s17 + $0x50] sm:$0xff] }
  0x33   : > { %v541_v35 = vshrl.u32 %v517_v24, 8  ;;  %v519_v37 = vxor.u32 %v495_v28, %v471_v17  ;;  %v472_v38 = vmul.u32 2221713035, %v448_v29  ;;  %v401_v43 = vmul.u32 2146121005, %v377_v33 }
  0x34   : > { %v586_v39 = vmul.f32 5.9604645e-08, %v562_v30  ;;  %v563_v40 = vcvt.s32.f32 %v539_v31  ;;  %v564_v41 = vcvt.s32.f32 %v540_v32  ;;  %v542_v45 = vshrl.u32 %v518_v36, 8  ;;  %v645_v30 = vld [vmem:[%s904_s17 + $0x58] sm:$0xff] }
  0x35   : > { %v565_v44 = vcvt.s32.f32 %v541_v35  ;;  %v543_v47 = vshrl.u32 %v519_v37, 8  ;;  %v496_v48 = vshrl.u32 %v472_v38, 16  ;;  %v425_v51 = vshrl.u32 %v401_v43, 15 }
  0x36   : > { %vm610_vm0 = vcmp.lt.f32.partialorder %v586_v39, 0.75  ;;  %v587_v49 = vmul.f32 5.9604645e-08, %v563_v40  ;;  %v588_v50 = vmul.f32 5.9604645e-08, %v564_v41  ;;  %v566_v54 = vcvt.s32.f32 %v542_v45 }
  0x37   : > { %v682_v52 = vsel %vm610_vm0, %v912_v23, 0.0  ;;  %v589_v53 = vmul.f32 5.9604645e-08, %v565_v44  ;;  %v567_v56 = vcvt.s32.f32 %v543_v47  ;;  %v520_v57 = vxor.u32 %v496_v48, %v472_v38 }
  0x38   : > { %706 = vst [vmem:[%s955_s20] sm:$0xff] %v682_v52  ;;  %vm611_vm1 = vcmp.lt.f32.partialorder %v587_v49, 0.75  ;;  %vm612_vm2 = vcmp.lt.f32.partialorder %v588_v50, 0.75  ;;  %v449_v59 = vxor.u32 %v425_v51, %v401_v43  ;;  %v590_v62 = vmul.f32 5.9604645e-08, %v566_v54  ;;  %v646_v52 = vld [vmem:[%s904_s17 + $0x60] sm:$0xff] }
  0x39   : > { %v683_v60 = vsel %vm611_vm1, %v914_v26, 0.0  ;;  %v684_v61 = vsel %vm612_vm2, %v916_v27, 0.0  ;;  %vm613_vm3 = vcmp.lt.f32.partialorder %v589_v53, 0.75  ;;  %v591_v63 = vmul.f32 5.9604645e-08, %v567_v56 }
  0x3a   : > { %707 = vst [vmem:[%s955_s20 + $0x8] sm:$0xff] %v683_v60  ;;  %708 = vst [vmem:[%s955_s20 + $0x10] sm:$0xff] %v684_v61  ;;  %v685_v23 = vsel %vm613_vm3, %v923_v42, 0.0  ;;  %v544_v0 = vshrl.u32 %v520_v57, 8  ;;  %v473_v1 = vmul.u32 2221713035, %v449_v59  ;;  %v180_v26 = vcvt.s32.f32 %v947_v5 }
  0x3b   : > { %709 = vst [vmem:[%s955_s20 + $0x18] sm:$0xff] %v685_v23  ;;  %vm614_vm4 = vcmp.lt.f32.partialorder %v590_v62, 0.75  ;;  %v664_v4 = vmul.f32 1.3333334, %v640_v58  ;;  %vm615_vm5 = vcmp.lt.f32.partialorder %v591_v63, 0.75  ;;  %v157_v12 = vadd.s32 1152, %v888_v3 }
  0x3c   : > { %v686_v27 = vsel %vm614_vm4, %v926_v46, 0.0  ;;  %v568_v7 = vcvt.s32.f32 %v544_v0  ;;  %v497_v8 = vshrl.u32 %v473_v1, 16  ;;  %v687_v42 = vsel %vm615_vm5, %v928_v55, 0.0 }
  0x3d   : > { %710 = vst [vmem:[%s955_s20 + $0x20] sm:$0xff] %v686_v27  ;;  %v665_v10 = vmul.f32 1.3333334, %v641_v2  ;;  %v204_v11 = vadd.f32 0.5, %v180_v26  ;;  %711 = vst [vmem:[%s955_s20 + $0x28] sm:$0xff] %v687_v42  ;;  %v158_v46 = vadd.s32 1280, %v888_v3  ;;  %v181_v17 = vcvt.s32.f32 %v157_v12 }
  0x3e   : > { %v592_v13 = vmul.f32 5.9604645e-08, %v568_v7  ;;  %v521_v14 = vxor.u32 %v497_v8, %v473_v1  ;;  %v975_v5 = vmul.f32 1.3333334, %v642_v6  ;;  %v978_v18 = vmul.f32 1.3333334, %v643_v9 }
  0x3f   : > { %v228_v16 = vmul.f32 0.33333334, %v204_v11  ;;  %v159_v55 = vadd.s32 1408, %v888_v3  ;;  %v182_v21 = vcvt.s32.f32 %v158_v46  ;;  %v160_v22 = vadd.s32 1536, %v888_v3 }
  0x40   : > { %vm616_vm6 = vcmp.lt.f32.partialorder %v592_v13, 0.75  ;;  %v545_v20 = vshrl.u32 %v521_v14, 8  ;;  %v205_v28 = vadd.f32 0.5, %v181_v17  ;;  %v985_v33 = vmul.f32 1.3333334, %v644_v19 }
  0x41   : > { %v688_v24 = vsel %vm616_vm6, %v664_v4, 0.0  ;;  %v252_v25 = vfloor.f32 %v228_v16  ;;  %v183_v29 = vcvt.s32.f32 %v159_v55  ;;  %v206_v32 = vadd.f32 0.5, %v182_v21 }
  0x42   : > { %712 = vst [vmem:[%s955_s20 + $0x30] sm:$0xff] %v688_v24  ;;  %v569_v31 = vcvt.s32.f32 %v545_v20  ;;  %v184_v35 = vcvt.s32.f32 %v160_v22  ;;  %v229_v37 = vmul.f32 0.33333334, %v205_v28  ;;  %v161_v39 = vadd.s32 1664, %v888_v3 }
  0x43   : > { %v812_v36 = vtrunc.f32 %v252_v25  ;;  %v207_v38 = vadd.f32 0.5, %v183_v29  ;;  %v230_v41 = vmul.f32 0.33333334, %v206_v32  ;;  %v988_v43 = vmul.f32 1.3333334, %v645_v30 }
  0x44   : > { %v593_v40 = vmul.f32 5.9604645e-08, %v569_v31  ;;  %v208_v44 = vadd.f32 0.5, %v184_v35  ;;  %v253_v47 = vfloor.f32 %v229_v37  ;;  %v185_v49 = vcvt.s32.f32 %v161_v39 }
  0x45   : > { %v813_v45 = vcvt.f32.s32 %v812_v36  ;;  %v231_v48 = vmul.f32 0.33333334, %v207_v38  ;;  %v254_v50 = vfloor.f32 %v230_v41  ;;  %v162_v53 = vadd.s32 1792, %v888_v3 }
  0x46   : > { %vm617_vm7 = vcmp.lt.f32.partialorder %v593_v40, 0.75  ;;  %v232_v51 = vmul.f32 0.33333334, %v208_v44  ;;  %v814_v57 = vtrunc.f32 %v253_v47  ;;  %v209_v61 = vadd.f32 0.5, %v185_v49 }
  0x47   : > { %v689_v54 = vsel %vm617_vm7, %v665_v10, 0.0  ;;  %v304_v56 = vadd.s32 %v813_v45, %v907_v15  ;;  %v255_v58 = vfloor.f32 %v231_v48  ;;  %v816_v59 = vtrunc.f32 %v254_v50 }
  0x48   : > { %713 = vst [vmem:[%s955_s20 + $0x38] sm:$0xff] %v689_v54  ;;  %v256_v60 = vfloor.f32 %v232_v51  ;;  %v186_v62 = vcvt.s32.f32 %v162_v53  ;;  %v815_v63 = vcvt.f32.s32 %v814_v57  ;;  %v995_v1 = vmul.f32 1.3333334, %v646_v52 }
  0x49   : > { %v330_v23 = vxor.u32 %v920_v34, %v304_v56  ;;  %v818_v0 = vtrunc.f32 %v255_v58  ;;  %v817_v2 = vcvt.f32.s32 %v816_v59  ;;  %v233_v26 = vmul.f32 0.33333334, %v209_v61 }
  0x4a   : > { %v820_v4 = vtrunc.f32 %v256_v60  ;;  %v210_v6 = vadd.f32 0.5, %v186_v62  ;;  %v305_v7 = vadd.s32 %v815_v63, %v907_v15  ;;  %v163_v9 = vadd.s32 1920, %v888_v3 }
  0x4b   : > { %v354_v27 = vshrl.u32 %v330_v23, 16  ;;  %v819_v8 = vcvt.f32.s32 %v818_v0  ;;  %v306_v42 = vadd.s32 %v817_v2, %v907_v15  ;;  %v257_v11 = vfloor.f32 %v233_v26 }
  0x4c   : > { %v821_v10 = vcvt.f32.s32 %v820_v4  ;;  %v234_v12 = vmul.f32 0.33333334, %v210_v6  ;;  %v331_v14 = vxor.u32 %v920_v34, %v305_v7  ;;  %v187_v16 = vcvt.s32.f32 %v163_v9 }
  0x4d   : > { %v378_v13 = vxor.u32 %v354_v27, %v330_v23  ;;  %v307_v46 = vadd.s32 %v819_v8, %v907_v15  ;;  %v332_v17 = vxor.u32 %v920_v34, %v306_v42  ;;  %v822_v55 = vtrunc.f32 %v257_v11 }
  0x4e   : > { %v308_v19 = vadd.s32 %v821_v10, %v907_v15  ;;  %v258_v20 = vfloor.f32 %v234_v12  ;;  %v355_v22 = vshrl.u32 %v331_v14, 16  ;;  %v211_v25 = vadd.f32 0.5, %v187_v16 }
  0x4f   : > { %v402_v21 = vmul.u32 2146121005, %v378_v13  ;;  %v333_v24 = vxor.u32 %v920_v34, %v307_v46  ;;  %v356_v28 = vshrl.u32 %v332_v17, 16  ;;  %v823_v30 = vcvt.f32.s32 %v822_v55 }
  0x50   : > { %v334_v29 = vxor.u32 %v920_v34, %v308_v19  ;;  %v824_v31 = vtrunc.f32 %v258_v20  ;;  %v379_v35 = vxor.u32 %v355_v22, %v331_v14  ;;  %v235_v37 = vmul.f32 0.33333334, %v211_v25 }
  0x51   : > { %v426_v32 = vshrl.u32 %v402_v21, 15  ;;  %v357_v36 = vshrl.u32 %v333_v24, 16  ;;  %v380_v38 = vxor.u32 %v356_v28, %v332_v17  ;;  %v309_v40 = vadd.s32 %v823_v30, %v907_v15 }
  0x52   : > { %v358_v39 = vshrl.u32 %v334_v29, 16  ;;  %v825_v41 = vcvt.f32.s32 %v824_v31  ;;  %v403_v45 = vmul.u32 2146121005, %v379_v35  ;;  %v259_v48 = vfloor.f32 %v235_v37 }
  0x53   : > { %v450_v44 = vxor.u32 %v426_v32, %v402_v21  ;;  %v381_v47 = vxor.u32 %v357_v36, %v333_v24  ;;  %v404_v49 = vmul.u32 2146121005, %v380_v38  ;;  %v335_v51 = vxor.u32 %v920_v34, %v309_v40 }
  0x54   : > { %v382_v50 = vxor.u32 %v358_v39, %v334_v29  ;;  %v310_v52 = vadd.s32 %v825_v41, %v907_v15  ;;  %v427_v54 = vshrl.u32 %v403_v45, 15  ;;  %v826_v57 = vtrunc.f32 %v259_v48 }
  0x55   : > { %v474_v53 = vmul.u32 2221713035, %v450_v44  ;;  %v405_v56 = vmul.u32 2146121005, %v381_v47  ;;  %v428_v58 = vshrl.u32 %v404_v49, 15  ;;  %v359_v60 = vshrl.u32 %v335_v51, 16 }
  0x56   : > { %v406_v59 = vmul.u32 2146121005, %v382_v50  ;;  %v336_v61 = vxor.u32 %v920_v34, %v310_v52  ;;  %v451_v23 = vxor.u32 %v427_v54, %v403_v45  ;;  %v827_v0 = vcvt.f32.s32 %v826_v57  ;;  %v647_v47 = vld [vmem:[%s904_s17 + $0x68] sm:$0xff] }
  0x57   : > { %v498_v62 = vshrl.u32 %v474_v53, 16  ;;  %v429_v63 = vshrl.u32 %v405_v56, 15  ;;  %v452_v2 = vxor.u32 %v428_v58, %v404_v49  ;;  %v383_v26 = vxor.u32 %v359_v60, %v335_v51 }
  0x58   : > { %v430_v4 = vshrl.u32 %v406_v59, 15  ;;  %v360_v6 = vshrl.u32 %v336_v61, 16  ;;  %v475_v7 = vmul.u32 2221713035, %v451_v23  ;;  %v311_v9 = vadd.s32 %v827_v0, %v907_v15 }
  0x59   : > { %v522_v27 = vxor.u32 %v498_v62, %v474_v53  ;;  %v453_v8 = vxor.u32 %v429_v63, %v405_v56  ;;  %v476_v42 = vmul.u32 2221713035, %v452_v2  ;;  %v407_v11 = vmul.u32 2146121005, %v383_v26 }
  0x5a   : > { %v454_v10 = vxor.u32 %v430_v4, %v406_v59  ;;  %v384_v12 = vxor.u32 %v360_v6, %v336_v61  ;;  %v499_v14 = vshrl.u32 %v475_v7, 16  ;;  %v337_v16 = vxor.u32 %v920_v34, %v311_v9  ;;  %v648_v4 = vld [vmem:[%s904_s17 + $0x70] sm:$0xff] }
  0x5b   : > { %v546_v13 = vshrl.u32 %v522_v27, 8  ;;  %v477_v46 = vmul.u32 2221713035, %v453_v8  ;;  %v500_v17 = vshrl.u32 %v476_v42, 16  ;;  %v431_v55 = vshrl.u32 %v407_v11, 15 }
  0x5c   : > { %v478_v19 = vmul.u32 2221713035, %v454_v10  ;;  %v408_v20 = vmul.u32 2146121005, %v384_v12  ;;  %v523_v22 = vxor.u32 %v499_v14, %v475_v7  ;;  %v361_v25 = vshrl.u32 %v337_v16, 16  ;;  %v649_v7 = vld [vmem:[%s904_s17 + $0x78] sm:$0xff] }
  0x5d   : > { %v570_v21 = vcvt.s32.f32 %v546_v13  ;;  %v501_v24 = vshrl.u32 %v477_v46, 16  ;;  %v524_v28 = vxor.u32 %v500_v17, %v476_v42  ;;  %v455_v30 = vxor.u32 %v431_v55, %v407_v11  ;;  %v650_v42 = vld [vmem:[%s904_s17 + $0x80] sm:$0xff]  ;;  %v651_v55 = vld [vmem:[%s904_s17 + $0x88] sm:$0xff] }
  0x5e   : > { %v502_v29 = vshrl.u32 %v478_v19, 16  ;;  %v432_v31 = vshrl.u32 %v408_v20, 15  ;;  %v547_v35 = vshrl.u32 %v523_v22, 8  ;;  %v385_v37 = vxor.u32 %v361_v25, %v337_v16 }
  0x5f   : > { %v594_v32 = vmul.f32 5.9604645e-08, %v570_v21  ;;  %v525_v36 = vxor.u32 %v501_v24, %v477_v46  ;;  %v548_v38 = vshrl.u32 %v524_v28, 8  ;;  %v479_v40 = vmul.u32 2221713035, %v455_v30 }
  0x60   : > { %v526_v39 = vxor.u32 %v502_v29, %v478_v19  ;;  %v456_v41 = vxor.u32 %v432_v31, %v408_v20  ;;  %v571_v44 = vcvt.s32.f32 %v547_v35  ;;  %v409_v48 = vmul.u32 2146121005, %v385_v37  ;;  %v652_v35 = vld [vmem:[%s904_s17 + $0x90] sm:$0xff] }
  0x61   : > { %vm618_vm8 = vcmp.lt.f32.partialorder %v594_v32, 0.75  ;;  %v549_v45 = vshrl.u32 %v525_v36, 8  ;;  %v572_v50 = vcvt.s32.f32 %v548_v38  ;;  %v503_v52 = vshrl.u32 %v479_v40, 16 }
  0x62   : > { %v690_v49 = vsel %vm618_vm8, %v975_v5, 0.0  ;;  %v550_v51 = vshrl.u32 %v526_v39, 8  ;;  %v595_v53 = vmul.f32 5.9604645e-08, %v571_v44  ;;  %v480_v56 = vmul.u32 2221713035, %v456_v41 }
  0x63   : > { %714 = vst [vmem:[%s955_s20 + $0x40] sm:$0xff] %v690_v49  ;;  %v573_v54 = vcvt.s32.f32 %v549_v45  ;;  %v433_v57 = vshrl.u32 %v409_v48, 15  ;;  %v596_v58 = vmul.f32 5.9604645e-08, %v572_v50  ;;  %v527_v60 = vxor.u32 %v503_v52, %v479_v40 }
  0x64   : > { %v574_v59 = vcvt.s32.f32 %v550_v51  ;;  %v671_v61 = vmul.f32 1.3333334, %v647_v47  ;;  %vm619_vm9 = vcmp.lt.f32.partialorder %v595_v53, 0.75  ;;  %v504_v23 = vshrl.u32 %v480_v56, 16  ;;  %v653_v47 = vld [vmem:[%s904_s17 + $0x98] sm:$0xff] }
  0x65   : > { %v597_v62 = vmul.f32 5.9604645e-08, %v573_v54  ;;  %v457_v5 = vxor.u32 %v433_v57, %v409_v48  ;;  %v691_v63 = vsel %vm619_vm9, %v978_v18, 0.0  ;;  %vm620_vm10 = vcmp.lt.f32.partialorder %v596_v58, 0.75 }
  0x66   : > { %v598_v0 = vmul.f32 5.9604645e-08, %v574_v59  ;;  %v551_v2 = vshrl.u32 %v527_v60, 8  ;;  %715 = vst [vmem:[%s955_s20 + $0x48] sm:$0xff] %v691_v63  ;;  %v692_v26 = vsel %vm620_vm10, %v985_v33, 0.0  ;;  %v528_v6 = vxor.u32 %v504_v23, %v480_v56  ;;  %v654_v60 = vld [vmem:[%s904_s17 + $0xa0] sm:$0xff] }
  0x67   : > { %vm621_vm11 = vcmp.lt.f32.partialorder %v597_v62, 0.75  ;;  %v481_v27 = vmul.u32 2221713035, %v457_v5  ;;  %716 = vst [vmem:[%s955_s20 + $0x50] sm:$0xff] %v692_v26  ;;  %v164_v18 = vadd.s32 2048, %v888_v3  ;;  %v165_v16 = vadd.s32 2176, %v888_v3 }
  0x68   : > { %v693_v8 = vsel %vm621_vm11, %v988_v43, 0.0  ;;  %vm622_vm12 = vcmp.lt.f32.partialorder %v598_v0, 0.75  ;;  %v575_v9 = vcvt.s32.f32 %v551_v2  ;;  %v552_v11 = vshrl.u32 %v528_v6, 8 }
  0x69   : > { %717 = vst [vmem:[%s955_s20 + $0x58] sm:$0xff] %v693_v8  ;;  %v694_v10 = vsel %vm622_vm12, %v995_v1, 0.0  ;;  %v672_v12 = vmul.f32 1.3333334, %v648_v4  ;;  %v505_v33 = vshrl.u32 %v481_v27, 16  ;;  %v188_v46 = vcvt.s32.f32 %v164_v18 }
  0x6a   : > { %718 = vst [vmem:[%s955_s20 + $0x60] sm:$0xff] %v694_v10  ;;  %v599_v13 = vmul.f32 5.9604645e-08, %v575_v9  ;;  %v673_v14 = vmul.f32 1.3333334, %v649_v7  ;;  %v576_v43 = vcvt.s32.f32 %v552_v11  ;;  %v1028_v19 = vmul.f32 1.3333334, %v650_v42 }
  0x6b   : > { %v529_v17 = vxor.u32 %v505_v33, %v481_v27  ;;  %v166_v20 = vadd.s32 2304, %v888_v3  ;;  %v212_v1 = vadd.f32 0.5, %v188_v46  ;;  %v189_v21 = vcvt.s32.f32 %v165_v16 }
  0x6c   : > { %vm623_vm13 = vcmp.lt.f32.partialorder %v599_v13, 0.75  ;;  %v167_v22 = vadd.s32 2432, %v888_v3  ;;  %v600_v25 = vmul.f32 5.9604645e-08, %v576_v43  ;;  %v1034_v32 = vmul.f32 1.3333334, %v651_v55 }
  0x6d   : > { %v695_v24 = vsel %vm623_vm13, %v671_v61, 0.0  ;;  %v553_v28 = vshrl.u32 %v529_v17, 8  ;;  %v190_v29 = vcvt.s32.f32 %v166_v20  ;;  %v236_v30 = vmul.f32 0.33333334, %v212_v1 }
  0x6e   : > { %719 = vst [vmem:[%s955_s20 + $0x68] sm:$0xff] %v695_v24  ;;  %v213_v31 = vadd.f32 0.5, %v189_v21  ;;  %v191_v36 = vcvt.s32.f32 %v167_v22  ;;  %vm624_vm14 = vcmp.lt.f32.partialorder %v600_v25, 0.75  ;;  %v168_v39 = vadd.s32 2560, %v888_v3 }
  0x6f   : > { %v577_v37 = vcvt.s32.f32 %v553_v28  ;;  %v214_v38 = vadd.f32 0.5, %v190_v29  ;;  %v696_v40 = vsel %vm624_vm14, %v672_v12, 0.0  ;;  %v260_v41 = vfloor.f32 %v236_v30 }
  0x70   : > { %v237_v44 = vmul.f32 0.33333334, %v213_v31  ;;  %v215_v45 = vadd.f32 0.5, %v191_v36  ;;  %720 = vst [vmem:[%s955_s20 + $0x70] sm:$0xff] %v696_v40  ;;  %v1040_v50 = vmul.f32 1.3333334, %v652_v35  ;;  %v192_v51 = vcvt.s32.f32 %v168_v39 }
  0x71   : > { %v601_v48 = vmul.f32 5.9604645e-08, %v577_v37  ;;  %v238_v49 = vmul.f32 0.33333334, %v214_v38  ;;  %v828_v52 = vtrunc.f32 %v260_v41  ;;  %v169_v56 = vadd.s32 2688, %v888_v3 }
  0x72   : > { %v261_v53 = vfloor.f32 %v237_v44  ;;  %v239_v54 = vmul.f32 0.33333334, %v215_v45  ;;  %v1043_v58 = vmul.f32 1.3333334, %v653_v47  ;;  %v216_v59 = vadd.f32 0.5, %v192_v51 }
  0x73   : > { %vm625_vm15 = vcmp.lt.f32.partialorder %v601_v48, 0.75  ;;  %v262_v57 = vfloor.f32 %v238_v49  ;;  %v829_v62 = vcvt.f32.s32 %v828_v52  ;;  %v193_v2 = vcvt.s32.f32 %v169_v56 }
  0x74   : > { %v697_v61 = vsel %vm625_vm15, %v673_v14, 0.0  ;;  %v830_v23 = vtrunc.f32 %v261_v53  ;;  %v263_v5 = vfloor.f32 %v239_v54  ;;  %v240_v0 = vmul.f32 0.33333334, %v216_v59 }
  0x75   : > { %721 = vst [vmem:[%s955_s20 + $0x78] sm:$0xff] %v697_v61  ;;  %v832_v63 = vtrunc.f32 %v262_v57  ;;  %v170_v4 = vadd.s32 2816, %v888_v3  ;;  %v312_v26 = vadd.s32 %v829_v62, %v907_v15  ;;  %v1049_v7 = vmul.f32 1.3333334, %v654_v60 }
  0x76   : > { %v831_v6 = vcvt.f32.s32 %v830_v23  ;;  %v834_v27 = vtrunc.f32 %v263_v5  ;;  %v264_v9 = vfloor.f32 %v240_v0  ;;  %v217_v18 = vadd.f32 0.5, %v193_v2 }
  0x77   : > { %v833_v8 = vcvt.f32.s32 %v832_v63  ;;  %v194_v42 = vcvt.s32.f32 %v170_v4  ;;  %v338_v10 = vxor.u32 %v920_v34, %v312_v26  ;;  %v171_v33 = vadd.s32 2944, %v888_v3 }
  0x78   : > { %v313_v11 = vadd.s32 %v831_v6, %v907_v15  ;;  %v835_v12 = vcvt.f32.s32 %v834_v27  ;;  %v836_v14 = vtrunc.f32 %v264_v9  ;;  %v241_v46 = vmul.f32 0.33333334, %v217_v18 }
  0x79   : > { %v314_v13 = vadd.s32 %v833_v8, %v907_v15  ;;  %v218_v16 = vadd.f32 0.5, %v194_v42  ;;  %v362_v43 = vshrl.u32 %v338_v10, 16  ;;  %v195_v20 = vcvt.s32.f32 %v171_v33 }
  0x7a   : > { %v339_v17 = vxor.u32 %v920_v34, %v313_v11  ;;  %v315_v55 = vadd.s32 %v835_v12, %v907_v15  ;;  %v837_v21 = vcvt.f32.s32 %v836_v14  ;;  %v265_v22 = vfloor.f32 %v241_v46 }
  0x7b   : > { %v340_v1 = vxor.u32 %v920_v34, %v314_v13  ;;  %v242_v24 = vmul.f32 0.33333334, %v218_v16  ;;  %v386_v25 = vxor.u32 %v362_v43, %v338_v10  ;;  %v219_v29 = vadd.f32 0.5, %v195_v20 }
  0x7c   : > { %v363_v28 = vshrl.u32 %v339_v17, 16  ;;  %v341_v3 = vxor.u32 %v920_v34, %v315_v55  ;;  %v316_v31 = vadd.s32 %v837_v21, %v907_v15  ;;  %v838_v35 = vtrunc.f32 %v265_v22 }
  0x7d   : > { %v364_v30 = vshrl.u32 %v340_v1, 16  ;;  %v266_v36 = vfloor.f32 %v242_v24  ;;  %v410_v37 = vmul.u32 2146121005, %v386_v25  ;;  %v243_v40 = vmul.f32 0.33333334, %v219_v29 }
  0x7e   : > { %v387_v38 = vxor.u32 %v363_v28, %v339_v17  ;;  %v365_v39 = vshrl.u32 %v341_v3, 16  ;;  %v342_v44 = vxor.u32 %v920_v34, %v316_v31  ;;  %v839_v45 = vcvt.f32.s32 %v838_v35 }
  0x7f   : > { %v388_v41 = vxor.u32 %v364_v30, %v340_v1  ;;  %v840_v47 = vtrunc.f32 %v266_v36  ;;  %v434_v48 = vshrl.u32 %v410_v37, 15  ;;  %v267_v52 = vfloor.f32 %v243_v40 }
  0x80   : > { %v411_v49 = vmul.u32 2146121005, %v387_v38  ;;  %v389_v51 = vxor.u32 %v365_v39, %v341_v3  ;;  %v366_v54 = vshrl.u32 %v342_v44, 16  ;;  %v317_v56 = vadd.s32 %v839_v45, %v907_v15 }
  0x81   : > { %v412_v53 = vmul.u32 2146121005, %v388_v41  ;;  %v841_v57 = vcvt.f32.s32 %v840_v47  ;;  %v458_v59 = vxor.u32 %v434_v48, %v410_v37  ;;  %v842_v62 = vtrunc.f32 %v267_v52 }
  0x82   : > { %v435_v60 = vshrl.u32 %v411_v49, 15  ;;  %v413_v61 = vmul.u32 2146121005, %v389_v51  ;;  %v390_v5 = vxor.u32 %v366_v54, %v342_v44  ;;  %v343_v63 = vxor.u32 %v920_v34, %v317_v56 }
  0x83   : > { %v436_v23 = vshrl.u32 %v412_v53, 15  ;;  %v318_v0 = vadd.s32 %v841_v57, %v907_v15  ;;  %v482_v2 = vmul.u32 2221713035, %v458_v59  ;;  %v843_v6 = vcvt.f32.s32 %v842_v62 }
  0x84   : > { %v459_v4 = vxor.u32 %v435_v60, %v411_v49  ;;  %v437_v26 = vshrl.u32 %v413_v61, 15  ;;  %v414_v8 = vmul.u32 2146121005, %v390_v5  ;;  %v367_v9 = vshrl.u32 %v343_v63, 16 }
  0x85   : > { %v460_v27 = vxor.u32 %v436_v23, %v412_v53  ;;  %v344_v18 = vxor.u32 %v920_v34, %v318_v0  ;;  %v506_v42 = vshrl.u32 %v482_v2, 16  ;;  %v319_v12 = vadd.s32 %v843_v6, %v907_v15 }
  0x86   : > { %v483_v10 = vmul.u32 2221713035, %v459_v4  ;;  %v461_v11 = vxor.u32 %v437_v26, %v413_v61  ;;  %v438_v13 = vshrl.u32 %v414_v8, 15  ;;  %v391_v14 = vxor.u32 %v367_v9, %v343_v63 }
  0x87   : > { %v484_v33 = vmul.u32 2221713035, %v460_v27  ;;  %v368_v46 = vshrl.u32 %v344_v18, 16  ;;  %v530_v16 = vxor.u32 %v506_v42, %v482_v2  ;;  %v345_v55 = vxor.u32 %v920_v34, %v319_v12 }
  0x88   : > { %v507_v43 = vshrl.u32 %v483_v10, 16  ;;  %v485_v17 = vmul.u32 2221713035, %v461_v11  ;;  %v462_v1 = vxor.u32 %v438_v13, %v414_v8  ;;  %v415_v21 = vmul.u32 2146121005, %v391_v14 }
  0x89   : > { %v508_v20 = vshrl.u32 %v484_v33, 16  ;;  %v392_v22 = vxor.u32 %v368_v46, %v344_v18  ;;  %v554_v24 = vshrl.u32 %v530_v16, 8  ;;  %v369_v3 = vshrl.u32 %v345_v55, 16  ;;  %v655_v18 = vld [vmem:[%s904_s17 + $0xa8] sm:$0xff]  ;;  %v657_v16 = vld [vmem:[%s904_s17 + $0xb8] sm:$0xff] }
  0x8a   : > { %v531_v25 = vxor.u32 %v507_v43, %v483_v10  ;;  %v509_v28 = vshrl.u32 %v485_v17, 16  ;;  %v486_v30 = vmul.u32 2221713035, %v462_v1  ;;  %v439_v15 = vshrl.u32 %v415_v21, 15 }
  0x8b   : > { %v532_v29 = vxor.u32 %v508_v20, %v484_v33  ;;  %v416_v31 = vmul.u32 2146121005, %v392_v22  ;;  %v578_v35 = vcvt.s32.f32 %v554_v24  ;;  %v393_v38 = vxor.u32 %v369_v3, %v345_v55  ;;  %v656_v33 = vld [vmem:[%s904_s17 + $0xb0] sm:$0xff] }
  0x8c   : > { %v555_v36 = vshrl.u32 %v531_v25, 8  ;;  %v533_v37 = vxor.u32 %v509_v28, %v485_v17  ;;  %v510_v40 = vshrl.u32 %v486_v30, 16  ;;  %v463_v41 = vxor.u32 %v439_v15, %v415_v21 }
  0x8d   : > { %v556_v39 = vshrl.u32 %v532_v29, 8  ;;  %v440_v34 = vshrl.u32 %v416_v31, 15  ;;  %v602_v44 = vmul.f32 5.9604645e-08, %v578_v35  ;;  %v417_v48 = vmul.u32 2146121005, %v393_v38 }
  0x8e   : > { %v579_v45 = vcvt.s32.f32 %v555_v36  ;;  %v557_v47 = vshrl.u32 %v533_v37, 8  ;;  %v534_v51 = vxor.u32 %v510_v40, %v486_v30  ;;  %v487_v52 = vmul.u32 2221713035, %v463_v41 }
  0x8f   : > { %v580_v49 = vcvt.s32.f32 %v556_v39  ;;  %v464_v53 = vxor.u32 %v440_v34, %v416_v31  ;;  %vm626_vm0 = vcmp.lt.f32.partialorder %v602_v44, 0.75  ;;  %v441_v57 = vshrl.u32 %v417_v48, 15 }
  0x90   : > { %v603_v54 = vmul.f32 5.9604645e-08, %v579_v45  ;;  %v581_v56 = vcvt.s32.f32 %v557_v47  ;;  %v698_v59 = vsel %vm626_vm0, %v1028_v19, 0.0  ;;  %v558_v61 = vshrl.u32 %v534_v51, 8 }
  0x91   : > { %v604_v60 = vmul.f32 5.9604645e-08, %v580_v49  ;;  %v511_v62 = vshrl.u32 %v487_v52, 16  ;;  %722 = vst [vmem:[%s955_s20 + $0x80] sm:$0xff] %v698_v59  ;;  %v488_v5 = vmul.u32 2221713035, %v464_v53  ;;  %v465_v63 = vxor.u32 %v441_v57, %v417_v48 }
  0x92   : > { %vm627_vm1 = vcmp.lt.f32.partialorder %v603_v54, 0.75  ;;  %v605_v23 = vmul.f32 5.9604645e-08, %v581_v56  ;;  %v582_v2 = vcvt.s32.f32 %v558_v61  ;;  %v679_v11 = vmul.f32 1.3333334, %v655_v18 }
  0x93   : > { %v699_v0 = vsel %vm627_vm1, %v1034_v32, 0.0  ;;  %vm628_vm2 = vcmp.lt.f32.partialorder %v604_v60, 0.75  ;;  %v535_v4 = vxor.u32 %v511_v62, %v487_v52  ;;  %v512_v19 = vshrl.u32 %v488_v5, 16 }
  0x94   : > { %723 = vst [vmem:[%s955_s20 + $0x88] sm:$0xff] %v699_v0  ;;  %v700_v26 = vsel %vm628_vm2, %v1040_v50, 0.0  ;;  %vm629_vm3 = vcmp.lt.f32.partialorder %v605_v23, 0.75  ;;  %v489_v6 = vmul.u32 2221713035, %v465_v63  ;;  %v606_v8 = vmul.f32 5.9604645e-08, %v582_v2 }
  0x95   : > { %724 = vst [vmem:[%s955_s20 + $0x90] sm:$0xff] %v700_v26  ;;  %v701_v27 = vsel %vm629_vm3, %v1043_v58, 0.0  ;;  %v559_v9 = vshrl.u32 %v535_v4, 8  ;;  %v536_v32 = vxor.u32 %v512_v19, %v488_v5  ;;  %v680_v43 = vmul.f32 1.3333334, %v656_v33 }
  0x96   : > { %725 = vst [vmem:[%s955_s20 + $0x98] sm:$0xff] %v701_v27  ;;  %v513_v42 = vshrl.u32 %v489_v6, 16  ;;  %vm630_vm4 = vcmp.lt.f32.partialorder %v606_v8, 0.75  ;;  %v681_v1 = vmul.f32 1.3333334, %v657_v16 }
  0x97   : > { %v583_v10 = vcvt.s32.f32 %v559_v9  ;;  %v702_v50 = vsel %vm630_vm4, %v1049_v7, 0.0  ;;  %v560_v12 = vshrl.u32 %v536_v32, 8 }
  0x98   : > { %v537_v13 = vxor.u32 %v513_v42, %v489_v6  ;;  %726 = vst [vmem:[%s955_s20 + $0xa0] sm:$0xff] %v702_v50 }
  0x99   : > { %v607_v14 = vmul.f32 5.9604645e-08, %v583_v10  ;;  %v584_v58 = vcvt.s32.f32 %v560_v12 }
  0x9a   : > { %v561_v46 = vshrl.u32 %v537_v13, 8 }
  0x9b   : > { %vm631_vm5 = vcmp.lt.f32.partialorder %v607_v14, 0.75  ;;  %v608_v55 = vmul.f32 5.9604645e-08, %v584_v58 }
  0x9c   : > { %v703_v17 = vsel %vm631_vm5, %v679_v11, 0.0  ;;  %v585_v20 = vcvt.s32.f32 %v561_v46 }
  0x9d   : > { %727 = vst [vmem:[%s955_s20 + $0xa8] sm:$0xff] %v703_v17  ;;  %vm632_vm6 = vcmp.lt.f32.partialorder %v608_v55, 0.75 }
  0x9e   : > { %v609_v7 = vmul.f32 5.9604645e-08, %v585_v20  ;;  %v704_v21 = vsel %vm632_vm6, %v680_v43, 0.0 }
  0x9f   : > { %728 = vst [vmem:[%s955_s20 + $0xb0] sm:$0xff] %v704_v21 }
  0xa0   : > { %vm633_vm7 = vcmp.lt.f32.partialorder %v609_v7, 0.75 }
  0xa1   : > { %v705_v22 = vsel %vm633_vm7, %v681_v1, 0.0 }
  0xa2   : > { %729 = vst [vmem:[%s955_s20 + $0xb8] sm:$0xff] %v705_v22 }
  0xa3 PF: > { %s13_s11 = sadd.s32 1, %s858_s11  }
  0xa4   : > { %p10_p4 = scmp.ge.s32.totalorder %s13_s11, 4  }
  0xa6   :  { %12 = sbr.rel (!%p10_p4) target bundleno = 2 (0x2), region = 58 }

</bundles_post_ra>
